<compile_context>
chip_gen: v5e
topology: v5e:2x2
jax: 0.10.0
libtpu: 0.0.40
codegen_flags: <defaults>
</compile_context>

<pallas_src>
import functools

import jax
import jax.numpy as jnp
from jax.experimental import pallas as pl
from jax.experimental.pallas import tpu as pltpu

LANE = 128          # TPU lane width; everything is padded to this
NUM_LAYERS = 5


def mlp_kernel(x_ref, w_ref, b_ref, o_ref):
    """Whole 5-layer MLP on one (TB, 128) batch tile, fully VMEM-resident.

    x_ref: (TB, 128)  bf16  -- features zero-padded to 128 lanes
    w_ref: (5, 128, 128) bf16 -- stacked zero-padded weights, [in, out] layout
    b_ref: (5, 128)  f32   -- stacked zero-padded biases
    o_ref: (TB, 128) f32   -- only column 0 is the real sigmoid output
    """
    h = x_ref[...]                                   # bf16 activations
    for layer in range(NUM_LAYERS - 1):              # static unroll: 4 hidden layers
        z = jnp.dot(h, w_ref[layer],
                    preferred_element_type=jnp.float32) + b_ref[layer]
        h = jnp.maximum(z, 0.0).astype(jnp.bfloat16)  # ReLU in f32, bf16 for next MXU pass
    z = jnp.dot(h, w_ref[NUM_LAYERS - 1],
                preferred_element_type=jnp.float32) + b_ref[NUM_LAYERS - 1]
    # sigmoid: exp -> EUP, approx reciprocal -> EUP (keeps epilogue off the VALU)
    o_ref[...] = pl.reciprocal(1.0 + jnp.exp(-z), approx=True)


def _round_up(v, m):
    return (v + m - 1) // m * m


def pack_params(params):
    """params: list of (W [in,out] f32, b [1,out] f32) -> stacked, lane-padded arrays."""
    ws, bs = [], []
    for w, b in params:
        in_d, out_d = w.shape
        wp = jnp.zeros((LANE, LANE), jnp.float32).at[:in_d, :out_d].set(w)
        bp = jnp.zeros((LANE,), jnp.float32).at[:out_d].set(b.reshape(-1))
        ws.append(wp)
        bs.append(bp)
    w_stack = jnp.stack(ws).astype(jnp.bfloat16)   # (5, 128, 128) bf16
    b_stack = jnp.stack(bs)                        # (5, 128)      f32
    return w_stack, b_stack


@functools.partial(jax.jit, static_argnames=("out_dim", "tb"))
def mlp_forward(x, w_stack, b_stack, out_dim, tb=512):
    """x: [B, input_dim] f32. Returns [B, out_dim] f32 sigmoid probabilities."""
    B, in_dim = x.shape
    # Batch tile: big enough to pipeline, multiple of 8 sublanes (or the full dim).
    tb = min(tb, _round_up(B, 8))
    Bp = _round_up(B, tb)

    # Zero-pad batch + feature dims, cast to bf16 for full-rate MXU input.
    xp = jnp.zeros((Bp, LANE), jnp.float32).at[:B, :in_dim].set(x)
    xp = xp.astype(jnp.bfloat16)

    grid = (Bp // tb,)
    out_padded = pl.pallas_call(
        mlp_kernel,
        out_shape=jax.ShapeDtypeStruct((Bp, LANE), jnp.float32),
        grid_spec=pltpu.PrefetchScalarGridSpec(
            num_scalar_prefetch=0,
            grid=grid,
            in_specs=[
                pl.BlockSpec((tb, LANE), lambda i: (i, 0)),                 # x tile
                pl.BlockSpec((NUM_LAYERS, LANE, LANE), lambda i: (0, 0, 0)),  # weights (resident)
                pl.BlockSpec((NUM_LAYERS, LANE), lambda i: (0, 0)),         # biases (resident)
            ],
            out_specs=pl.BlockSpec((tb, LANE), lambda i: (i, 0)),
        ),
        compiler_params=pltpu.CompilerParams(
            dimension_semantics=("parallel",)),     # megacore-shard the batch axis
    )(xp, w_stack, b_stack)

    return out_padded[:B, :out_dim]


def init_params(key, input_dim, output_dim):
    """Deterministic init matching the layer shapes of the PyTorch module."""
    dims = [input_dim, 64, 128, 64, 32, output_dim]
    params = []
    for i in range(len(dims) - 1):
        kw, kb, key = jax.random.split(key, 3)
        fan_in = dims[i]
        bound = 1.0 / (fan_in ** 0.5)
        w = jax.random.uniform(kw, (dims[i], dims[i + 1]), jnp.float32, -bound, bound)
        b = jax.random.uniform(kb, (1, dims[i + 1]), jnp.float32, -bound, bound)
        params.append((w, b))
    return params


def reference_forward(x, params):
    """Pure-JAX f32 reference of the same forward pass."""
    h = x
    for i, (w, b) in enumerate(params):
        h = h @ w + b
        if i < len(params) - 1:
            h = jnp.maximum(h, 0.0)
    return jax.nn.sigmoid(h)


if __name__ == "__main__":
    key = jax.random.PRNGKey(0)
    input_dim = 8    # Titanic-style feature count after dropping Name/Survived
    output_dim = 1   # single sigmoid survival probability

    k_x, k_x2, k_p = jax.random.split(key, 3)
    params = init_params(k_p, input_dim, output_dim)
    w_stack, b_stack = pack_params(params)

    # Small single-tile case (B=8 -> one grid step).
    x = jax.random.normal(k_x, (8, input_dim), dtype=jnp.float32)
    out = mlp_forward(x, w_stack, b_stack, out_dim=output_dim)
    out = jax.block_until_ready(out)
    ref = reference_forward(x, params)
    assert out.shape == (8, output_dim)
    # bf16 matmul inputs + approx reciprocal -> loose-ish tolerance vs f32 reference
    assert jnp.allclose(out, ref, atol=2e-2, rtol=2e-2), "mismatch vs reference (B=8)"

    # Multi-tile case exercising the batch grid + padding (B=40, tile=16 -> grid=(3,)).
    x2 = jax.random.normal(k_x2, (40, input_dim), dtype=jnp.float32)
    out2 = mlp_forward(x2, w_stack, b_stack, out_dim=output_dim, tb=16)
    out2 = jax.block_until_ready(out2)
    ref2 = reference_forward(x2, params)
    assert out2.shape == (40, output_dim)
    assert jnp.allclose(out2, ref2, atol=2e-2, rtol=2e-2), "mismatch vs reference (B=40)"

    print("KERNEL_OK")
</pallas_src>

<mosaic_0001>
module attributes {stable_mosaic.version = 11 : i64} {
  func.func @mlp_kernel(%arg0: i32, %arg1: memref<8x128xbf16, #tpu.memory_space<vmem>>, %arg2: memref<5x128x128xbf16, #tpu.memory_space<vmem>>, %arg3: memref<5x128xf32, #tpu.memory_space<vmem>>, %arg4: memref<8x128xf32, #tpu.memory_space<vmem>>) attributes {dimension_semantics = [#tpu.dimension_semantics<parallel>], iteration_bounds = array<i64: 1>, scalar_prefetch = 0 : i64, scratch_operands = 0 : i64, tpu.core_type = #tpu.core_type<tc>, window_params = [{transform_indices = @transform_0, window_bounds = array<i64: 8, 128>}, {pipeline_mode = #tpu.pipeline_mode<synchronous>, transform_indices = @transform_1, window_bounds = array<i64: 5, 128, 128>}, {pipeline_mode = #tpu.pipeline_mode<synchronous>, transform_indices = @transform_2, window_bounds = array<i64: 5, 128>}, {transform_indices = @transform_3, window_bounds = array<i64: 8, 128>}]} {
    %c0 = arith.constant 0 : index
    %c0_0 = arith.constant 0 : index
    %0 = vector.load %arg1[%c0, %c0_0] : memref<8x128xbf16, #tpu.memory_space<vmem>>, vector<8x128xbf16>
    %c0_1 = arith.constant 0 : index
    %c0_2 = arith.constant 0 : index
    %c0_3 = arith.constant 0 : index
    %1 = vector.load %arg2[%c0_1, %c0_2, %c0_3] : memref<5x128x128xbf16, #tpu.memory_space<vmem>>, vector<1x128x128xbf16>
    %2 = vector.shape_cast %1 : vector<1x128x128xbf16> to vector<128x128xbf16>
    %cst = arith.constant dense<0.000000e+00> : vector<8x128xf32>
    %3 = tpu.matmul %0, %2, %cst {dimension_numbers = #tpu.dot_dimension_numbers<[1], [0], [0], [1], [0, 0, 1, 1], [], []>} : vector<8x128xbf16>, vector<128x128xbf16>, vector<8x128xf32> -> vector<8x128xf32>
    %c0_4 = arith.constant 0 : index
    %c0_5 = arith.constant 0 : index
    %4 = vector.load %arg3[%c0_4, %c0_5] : memref<5x128xf32, #tpu.memory_space<vmem>>, vector<1x128xf32>
    %5 = vector.shape_cast %4 : vector<1x128xf32> to vector<128xf32>
    %6 = vector.shape_cast %5 : vector<128xf32> to vector<1x128xf32>
    %7 = vector.broadcast %6 : vector<1x128xf32> to vector<8x128xf32>
    %8 = arith.addf %3, %7 : vector<8x128xf32>
    %cst_6 = arith.constant 0.000000e+00 : f32
    %9 = vector.broadcast %cst_6 : f32 to vector<8x128xf32>
    %10 = arith.maximumf %8, %9 : vector<8x128xf32>
    %11 = arith.truncf %10 : vector<8x128xf32> to vector<8x128xbf16>
    %c1 = arith.constant 1 : index
    %c0_7 = arith.constant 0 : index
    %c0_8 = arith.constant 0 : index
    %12 = vector.load %arg2[%c1, %c0_7, %c0_8] : memref<5x128x128xbf16, #tpu.memory_space<vmem>>, vector<1x128x128xbf16>
    %13 = vector.shape_cast %12 : vector<1x128x128xbf16> to vector<128x128xbf16>
    %cst_9 = arith.constant dense<0.000000e+00> : vector<8x128xf32>
    %14 = tpu.matmul %11, %13, %cst_9 {dimension_numbers = #tpu.dot_dimension_numbers<[1], [0], [0], [1], [0, 0, 1, 1], [], []>} : vector<8x128xbf16>, vector<128x128xbf16>, vector<8x128xf32> -> vector<8x128xf32>
    %c1_10 = arith.constant 1 : index
    %c0_11 = arith.constant 0 : index
    %15 = vector.load %arg3[%c1_10, %c0_11] : memref<5x128xf32, #tpu.memory_space<vmem>>, vector<1x128xf32>
    %16 = vector.shape_cast %15 : vector<1x128xf32> to vector<128xf32>
    %17 = vector.shape_cast %16 : vector<128xf32> to vector<1x128xf32>
    %18 = vector.broadcast %17 : vector<1x128xf32> to vector<8x128xf32>
    %19 = arith.addf %14, %18 : vector<8x128xf32>
    %cst_12 = arith.constant 0.000000e+00 : f32
    %20 = vector.broadcast %cst_12 : f32 to vector<8x128xf32>
    %21 = arith.maximumf %19, %20 : vector<8x128xf32>
    %22 = arith.truncf %21 : vector<8x128xf32> to vector<8x128xbf16>
    %c2 = arith.constant 2 : index
    %c0_13 = arith.constant 0 : index
    %c0_14 = arith.constant 0 : index
    %23 = vector.load %arg2[%c2, %c0_13, %c0_14] : memref<5x128x128xbf16, #tpu.memory_space<vmem>>, vector<1x128x128xbf16>
    %24 = vector.shape_cast %23 : vector<1x128x128xbf16> to vector<128x128xbf16>
    %cst_15 = arith.constant dense<0.000000e+00> : vector<8x128xf32>
    %25 = tpu.matmul %22, %24, %cst_15 {dimension_numbers = #tpu.dot_dimension_numbers<[1], [0], [0], [1], [0, 0, 1, 1], [], []>} : vector<8x128xbf16>, vector<128x128xbf16>, vector<8x128xf32> -> vector<8x128xf32>
    %c2_16 = arith.constant 2 : index
    %c0_17 = arith.constant 0 : index
    %26 = vector.load %arg3[%c2_16, %c0_17] : memref<5x128xf32, #tpu.memory_space<vmem>>, vector<1x128xf32>
    %27 = vector.shape_cast %26 : vector<1x128xf32> to vector<128xf32>
    %28 = vector.shape_cast %27 : vector<128xf32> to vector<1x128xf32>
    %29 = vector.broadcast %28 : vector<1x128xf32> to vector<8x128xf32>
    %30 = arith.addf %25, %29 : vector<8x128xf32>
    %cst_18 = arith.constant 0.000000e+00 : f32
    %31 = vector.broadcast %cst_18 : f32 to vector<8x128xf32>
    %32 = arith.maximumf %30, %31 : vector<8x128xf32>
    %33 = arith.truncf %32 : vector<8x128xf32> to vector<8x128xbf16>
    %c3 = arith.constant 3 : index
    %c0_19 = arith.constant 0 : index
    %c0_20 = arith.constant 0 : index
    %34 = vector.load %arg2[%c3, %c0_19, %c0_20] : memref<5x128x128xbf16, #tpu.memory_space<vmem>>, vector<1x128x128xbf16>
    %35 = vector.shape_cast %34 : vector<1x128x128xbf16> to vector<128x128xbf16>
    %cst_21 = arith.constant dense<0.000000e+00> : vector<8x128xf32>
    %36 = tpu.matmul %33, %35, %cst_21 {dimension_numbers = #tpu.dot_dimension_numbers<[1], [0], [0], [1], [0, 0, 1, 1], [], []>} : vector<8x128xbf16>, vector<128x128xbf16>, vector<8x128xf32> -> vector<8x128xf32>
    %c3_22 = arith.constant 3 : index
    %c0_23 = arith.constant 0 : index
    %37 = vector.load %arg3[%c3_22, %c0_23] : memref<5x128xf32, #tpu.memory_space<vmem>>, vector<1x128xf32>
    %38 = vector.shape_cast %37 : vector<1x128xf32> to vector<128xf32>
    %39 = vector.shape_cast %38 : vector<128xf32> to vector<1x128xf32>
    %40 = vector.broadcast %39 : vector<1x128xf32> to vector<8x128xf32>
    %41 = arith.addf %36, %40 : vector<8x128xf32>
    %cst_24 = arith.constant 0.000000e+00 : f32
    %42 = vector.broadcast %cst_24 : f32 to vector<8x128xf32>
    %43 = arith.maximumf %41, %42 : vector<8x128xf32>
    %44 = arith.truncf %43 : vector<8x128xf32> to vector<8x128xbf16>
    %c4 = arith.constant 4 : index
    %c0_25 = arith.constant 0 : index
    %c0_26 = arith.constant 0 : index
    %45 = vector.load %arg2[%c4, %c0_25, %c0_26] : memref<5x128x128xbf16, #tpu.memory_space<vmem>>, vector<1x128x128xbf16>
    %46 = vector.shape_cast %45 : vector<1x128x128xbf16> to vector<128x128xbf16>
    %cst_27 = arith.constant dense<0.000000e+00> : vector<8x128xf32>
    %47 = tpu.matmul %44, %46, %cst_27 {dimension_numbers = #tpu.dot_dimension_numbers<[1], [0], [0], [1], [0, 0, 1, 1], [], []>} : vector<8x128xbf16>, vector<128x128xbf16>, vector<8x128xf32> -> vector<8x128xf32>
    %c4_28 = arith.constant 4 : index
    %c0_29 = arith.constant 0 : index
    %48 = vector.load %arg3[%c4_28, %c0_29] : memref<5x128xf32, #tpu.memory_space<vmem>>, vector<1x128xf32>
    %49 = vector.shape_cast %48 : vector<1x128xf32> to vector<128xf32>
    %50 = vector.shape_cast %49 : vector<128xf32> to vector<1x128xf32>
    %51 = vector.broadcast %50 : vector<1x128xf32> to vector<8x128xf32>
    %52 = arith.addf %47, %51 : vector<8x128xf32>
    %cst_30 = arith.constant 0.000000e+00 : f32
    %53 = vector.broadcast %cst_30 : f32 to vector<8x128xf32>
    %54 = arith.subf %53, %52 : vector<8x128xf32>
    %55 = math.exp %54 : vector<8x128xf32>
    %cst_31 = arith.constant 1.000000e+00 : f32
    %56 = vector.broadcast %cst_31 : f32 to vector<8x128xf32>
    %57 = arith.addf %56, %55 : vector<8x128xf32>
    %58 = tpu.reciprocal %57 {approx = true} : vector<8x128xf32> -> vector<8x128xf32>
    %c0_32 = arith.constant 0 : index
    %c0_33 = arith.constant 0 : index
    %59 = vector.load %arg4[%c0_32, %c0_33] : memref<8x128xf32, #tpu.memory_space<vmem>>, vector<8x128xf32>
    tpu.vector_store %arg4[%c0_32, %c0_33], %58 {strides = array<i32>} : memref<8x128xf32, #tpu.memory_space<vmem>>, vector<8x128xf32>,
    return
  }
  func.func @transform_0(%arg0: i32) -> (i32, i32) {
    %c0_i32 = arith.constant 0 : i32
    %c0_i32_0 = arith.constant 0 : i32
    return %arg0, %c0_i32 : i32, i32
  }
  func.func @transform_1(%arg0: i32) -> (i32, i32, i32) {
    %c0_i32 = arith.constant 0 : i32
    %c0_i32_0 = arith.constant 0 : i32
    %c0_i32_1 = arith.constant 0 : i32
    %c0_i32_2 = arith.constant 0 : i32
    return %c0_i32, %c0_i32_0, %c0_i32_1 : i32, i32, i32
  }
  func.func @transform_2(%arg0: i32) -> (i32, i32) {
    %c0_i32 = arith.constant 0 : i32
    %c0_i32_0 = arith.constant 0 : i32
    %c0_i32_1 = arith.constant 0 : i32
    return %c0_i32, %c0_i32_0 : i32, i32
  }
  func.func @transform_3(%arg0: i32) -> (i32, i32) {
    %c0_i32 = arith.constant 0 : i32
    %c0_i32_0 = arith.constant 0 : i32
    return %arg0, %c0_i32 : i32, i32
  }
}

</mosaic_0001>

<bundles_post_ra>
// kernel: mlp_forward.1
= control target key start
LH: loop header
LB: loop body
LE: loop exit
PB: predicated region body
PF: predicated region fallthrough
CT: control target
= control target key end

     0   :  { %8 = vsyncpa [#allocation3], 0  ;;  %s687_s15 = smov [#allocation2]   ;;  %s688_s17 = smov 64   ;;  %s734_s0 = inlined_call_operand.vmem [shape: bf16[8,128], index: 0, kind: input, shape index: {}]   ;;  %s735_s1 = inlined_call_operand.hbm [shape: bf16[5,128,128], index: 1, kind: input, shape index: {}]   ;;  %s736_s2 = inlined_call_operand.vmem [shape: f32[5,128], index: 2, kind: input, shape index: {}]   ;;  %s737_s3 = inlined_call_operand.vmem [shape: f32[8,128], index: 3, kind: output, shape index: {}]  }
   0x1   :  { %s15_s14 = sshll.u32 %s735_s1, 4  ;;  %s17_s16 = sshll.u32 %s687_s15, 4  ;;  %s16_s14 = int_to_ptr.hbm [resolvable:$true] %s15_s14  ;;  %s18_s16 = int_to_ptr.vmem [resolvable:$true] %s17_s16 }
   0x2   :  { %s689_s18 = smov 4  }
   0x3   :  { %23 = dma.hbm_to_vmem [thread:$0]  %s16_s14, 5120, %s18_s16, [#allocation3], %s688_s17, %s688_s17, %s689_s18  }
   0x4   :  { %685 = dma.done.wait [#allocation3], 5120  }
   0x5   :  { %686 = vsyncadd [#allocation3], 4294962176  ;;  %v616_v0 = vld [vmem:[#allocation2 + $0x38] sm:$0xff]  ;;  %v615_v1 = vld [vmem:[#allocation2 + $0x30] sm:$0xff] }
   0x6   :  { %97 = vmatpush.bf16.msra.mxu0 %v616_v0  ;;  %v624_v2 = vld [vmem:[#allocation2 + $0x78] sm:$0xff]  ;;  %v614_v3 = vld [vmem:[#allocation2 + $0x28] sm:$0xff]  ;;  %v623_v4 = vld [vmem:[#allocation2 + $0x70] sm:$0xff] }
   0x7   :  { %179 = vmatpush.bf16.msra.mxu1 %v624_v2  ;;  %v622_v5 = vld [vmem:[#allocation2 + $0x68] sm:$0xff]  ;;  %v613_v6 = vld [vmem:[#allocation2 + $0x20] sm:$0xff]  ;;  %v612_v8 = vld [vmem:[#allocation2 + $0x18] sm:$0xff] }
   0x8   :  { %v621_v7 = vld [vmem:[#allocation2 + $0x60] sm:$0xff]  ;;  %v620_v9 = vld [vmem:[#allocation2 + $0x58] sm:$0xff]  ;;  %v611_v10 = vld [vmem:[#allocation2 + $0x10] sm:$0xff] }
   0x9   :  { %v619_v11 = vld [vmem:[#allocation2 + $0x50] sm:$0xff]  ;;  %v610_v12 = vld [vmem:[#allocation2 + $0x8] sm:$0xff]  ;;  %v609_v13 = vld [vmem:[#allocation2] sm:$0xff] }
   0xa   :  { %98 = vmatpush.bf16.msra.mxu0 %v615_v1  ;;  %v30_v14 = vld [vmem:[%s734_s0] sm:$0xf]  ;;  %v618_v15 = vld [vmem:[#allocation2 + $0x48] sm:$0xff]  ;;  %v632_v17 = vld [vmem:[#allocation2 + $0xb8] sm:$0xff] }
   0xb   :  { %180 = vmatpush.bf16.msra.mxu1 %v623_v4  ;;  %v617_v16 = vld [vmem:[#allocation2 + $0x40] sm:$0xff]  ;;  %261 = vmatpush.bf16.msra.mxu2 %v632_v17  ;;  %v631_v18 = vld [vmem:[#allocation2 + $0xb0] sm:$0xff]  ;;  %v630_v19 = vld [vmem:[#allocation2 + $0xa8] sm:$0xff] }
   0xc   :  { %v629_v20 = vld [vmem:[#allocation2 + $0xa0] sm:$0xff]  ;;  %v628_v21 = vld [vmem:[#allocation2 + $0x98] sm:$0xff]  ;;  %v627_v22 = vld [vmem:[#allocation2 + $0x90] sm:$0xff] }
   0xd   :  { %v652_v23 = vld [vmem:[%s736_s2] ss:$0 sm:$0xff]  ;;  %v626_v29 = vld [vmem:[#allocation2 + $0x88] sm:$0xff]  ;;  %v640_v31 = vld [vmem:[#allocation2 + $0xf8] sm:$0xff] }
   0xe   :  { %99 = vmatpush.bf16.msra.mxu0 %v614_v3  ;;  %v625_v30 = vld [vmem:[#allocation2 + $0x80] sm:$0xff]  ;;  %343 = vmatpush.bf16.msra.mxu3 %v640_v31  ;;  %v639_v32 = vld [vmem:[#allocation2 + $0xf0] sm:$0xff]  ;;  %v638_v33 = vld [vmem:[#allocation2 + $0xe8] sm:$0xff] }
   0xf   :  { %181 = vmatpush.bf16.msra.mxu1 %v622_v5  ;;  %262 = vmatpush.bf16.msra.mxu2 %v631_v18  ;;  %v637_v34 = vld [vmem:[#allocation2 + $0xe0] sm:$0xff]  ;;  %v636_v35 = vld [vmem:[#allocation2 + $0xd8] sm:$0xff]  ;;  %v635_v36 = vld [vmem:[#allocation2 + $0xd0] sm:$0xff] }
  0x10   :  { %v653_v37 = vld [vmem:[%s736_s2 + $0x1] ss:$0 sm:$0xff]  ;;  %v634_v43 = vld [vmem:[#allocation2 + $0xc8] sm:$0xff]  ;;  %v648_v45 = vld [vmem:[#allocation2 + $0x138] sm:$0xff] }
  0x11   :  { %v633_v44 = vld [vmem:[#allocation2 + $0xc0] sm:$0xff]  ;;  %v647_v46 = vld [vmem:[#allocation2 + $0x130] sm:$0xff]  ;;  %v646_v47 = vld [vmem:[#allocation2 + $0x128] sm:$0xff] }
  0x12   :  { %100 = vmatpush.bf16.msra.mxu0 %v613_v6  ;;  %344 = vmatpush.bf16.msra.mxu3 %v639_v32  ;;  %v645_v48 = vld [vmem:[#allocation2 + $0x120] sm:$0xff]  ;;  %v644_v49 = vld [vmem:[#allocation2 + $0x118] sm:$0xff]  ;;  %v643_v50 = vld [vmem:[#allocation2 + $0x110] sm:$0xff] }
  0x13   :  { %182 = vmatpush.bf16.msra.mxu1 %v621_v7  ;;  %263 = vmatpush.bf16.msra.mxu2 %v630_v19  ;;  %v654_v51 = vld [vmem:[%s736_s2 + $0x2] ss:$0 sm:$0xff]  ;;  %v642_v57 = vld [vmem:[#allocation2 + $0x108] sm:$0xff]  ;;  %v655_v59 = vld [vmem:[%s736_s2 + $0x3] ss:$0 sm:$0xff] }
  0x14   :  { %v641_v58 = vld [vmem:[#allocation2 + $0x100] sm:$0xff] }
  0x15   :  { %v656_v1 = vld [vmem:[%s736_s2 + $0x4] ss:$0 sm:$0xff] }
  0x16   :  { %101 = vmatpush.bf16.msra.mxu0 %v612_v8  ;;  %345 = vmatpush.bf16.msra.mxu3 %v638_v33 }
  0x17   :  { %183 = vmatpush.bf16.msra.mxu1 %v620_v9  ;;  %264 = vmatpush.bf16.msra.mxu2 %v629_v20 }
  0x1a   :  { %102 = vmatpush.bf16.msra.mxu0 %v611_v10  ;;  %346 = vmatpush.bf16.msra.mxu3 %v637_v34 }
  0x1b   :  { %184 = vmatpush.bf16.msra.mxu1 %v619_v11  ;;  %265 = vmatpush.bf16.msra.mxu2 %v628_v21 }
  0x1e   :  { %103 = vmatpush.bf16.msra.mxu0 %v610_v12  ;;  %347 = vmatpush.bf16.msra.mxu3 %v636_v35 }
  0x1f   :  { %185 = vmatpush.bf16.msra.mxu1 %v618_v15  ;;  %266 = vmatpush.bf16.msra.mxu2 %v627_v22 }
  0x22   :  { %104 = vmatpush.bf16.msra.mxu0 %v609_v13  ;;  %348 = vmatpush.bf16.msra.mxu3 %v635_v36 }
  0x23   :  { %186 = vmatpush.bf16.msra.mxu1 %v617_v16  ;;  %267 = vmatpush.bf16.msra.mxu2 %v626_v29 }
  0x25   :  { %105 = vmatmul.bf16.vlgmr.msra.gmra.mxu0 %v30_v14 }
  0x26   :  { %349 = vmatpush.bf16.msra.mxu3 %v634_v43  ;;  %425 = vmatpush.bf16.msrb.mxu0 %v648_v45 }
  0x27   :  { %268 = vmatpush.bf16.msra.mxu2 %v625_v30 }
  0x2a   :  { %350 = vmatpush.bf16.msra.mxu3 %v633_v44  ;;  %426 = vmatpush.bf16.msrb.mxu0 %v647_v46 }
  0x2e   :  { %427 = vmatpush.bf16.msrb.mxu0 %v646_v47 }
  0x32   :  { %428 = vmatpush.bf16.msrb.mxu0 %v645_v48 }
  0x36   :  { %429 = vmatpush.bf16.msrb.mxu0 %v644_v49 }
  0x3a   :  { %430 = vmatpush.bf16.msrb.mxu0 %v643_v50 }
  0x3e   :  { %431 = vmatpush.bf16.msrb.mxu0 %v642_v57 }
  0x42   :  { %432 = vmatpush.bf16.msrb.mxu0 %v641_v58 }
  0xa2   :  { %v106_v24 = vpop.f32.mrf.mxu0 }
  0xa3   :  { %v107_v25 = vadd.f32 %v652_v23, %v106_v24 }
  0xa5   :  { %v110_v26 = vmax.f32 %v107_v25, 0.0 }
  0xa7   :  { %v111_v27 = vpack.c.bf16 %v110_v26, %v110_v26 }
  0xa9   :  { %187 = vmatmul.bf16.vlgmr.msra.gmra.mxu1 %v111_v27 }
  0xaa   :  { %v108_v28 = vpop.f32.mrf.mxu0 }
 0x126   :  { %v188_v38 = vpop.f32.mrf.mxu1 }
 0x127   :  { %v189_v39 = vadd.f32 %v653_v37, %v188_v38 }
 0x129   :  { %v192_v40 = vmax.f32 %v189_v39, 0.0 }
 0x12b   :  { %v193_v41 = vpack.c.bf16 %v192_v40, %v192_v40 }
 0x12d   :  { %269 = vmatmul.bf16.vlgmr.msra.gmra.mxu2 %v193_v41 }
 0x12e   :  { %v190_v42 = vpop.f32.mrf.mxu1 }
 0x1b0   :  { %v270_v52 = vpop.f32.mrf.mxu2 }
 0x1b1   :  { %v271_v53 = vadd.f32 %v654_v51, %v270_v52 }
 0x1b3   :  { %v274_v54 = vmax.f32 %v271_v53, 0.0 }
 0x1b5   :  { %v275_v55 = vpack.c.bf16 %v274_v54, %v274_v54 }
 0x1b7   :  { %351 = vmatmul.bf16.vlgmr.msra.gmra.mxu3 %v275_v55 }
 0x1b8   :  { %v272_v56 = vpop.f32.mrf.mxu2 }
 0x23a   :  { %v352_v60 = vpop.f32.mrf.mxu3 }
 0x23b   :  { %v353_v61 = vadd.f32 %v655_v59, %v352_v60 }
 0x23d   :  { %v356_v62 = vmax.f32 %v353_v61, 0.0 }
 0x23f   :  { %v357_v63 = vpack.c.bf16 %v356_v62, %v356_v62 }
 0x241   :  { %433 = vmatmul.bf16.vlgmr.msrb.gmra.mxu0 %v357_v63 }
 0x242   :  { %v354_v0 = vpop.f32.mrf.mxu3 }
 0x2be   :  { %v434_v2 = vpop.f32.mrf.mxu0 }
 0x2bf   :  { %v435_v3 = vadd.f32 %v656_v1, %v434_v2 }
 0x2c1   :  { %v438_v4 = vsub.f32 0.0, %v435_v3 }
 0x2c3   :  { %v439_v5 = vmul.f32 1.442695, %v438_v4 }
 0x2c5   :  { %657 = vpow2.f32 %v439_v5 }
 0x2c6   :  { %v436_v6 = vpop.f32.mrf.mxu0 }
 0x2cb   :  { %v658_v7 = vpop.eup %657 }
 0x2cc   :  { %v441_v8 = vadd.f32 1.0, %v658_v7 }
 0x2ce   :  { %659 = vrcp.f32 %v441_v8 }
 0x2d4   :  { %v660_v9 = vpop.eup %659 }
 0x2d5   :  { %443 = vst [vmem:[%s737_s3] sm:$0xff] %v660_v9 }
 0x2d6   :  { %448 = vsyncpa [#allocation3], 1 }

</bundles_post_ra>
